<compile_context>
chip_gen: v6e
topology: v6e:2x2x1
jax: 0.10.0
libtpu: 0.0.40
codegen_flags: <defaults>
</compile_context>

<pallas_src>
import jax
import jax.numpy as jnp
from jax.experimental import pallas as pl
from jax.experimental.pallas import tpu as pltpu


def _qvalue_kernel(a0_ref, x_ref, st_ref, w1_ref, b1_ref, wc_ref, bc_ref,
                   src_ref, dst_ref, ew_ref, o_ref):
    # ---------------- dense part ----------------
    a0 = a0_ref[0, 0]                                   # alpha0 weight (SMEM scalar)
    h = x_ref[...] + st_ref[...] * a0                   # x + alpha0(states)  (N,F)

    # alpha1 linear + leaky_relu(0.2)   (MXU; weights may be bf16, f32 accumulate)
    y = jnp.dot(h.astype(w1_ref.dtype), w1_ref[...],
                preferred_element_type=jnp.float32) + b1_ref[...]
    y = jnp.where(y > 0, y, jnp.float32(0.2) * y)

    # conv.lin linear                   (MXU)
    z = jnp.dot(y.astype(wc_ref.dtype), wc_ref[...],
                preferred_element_type=jnp.float32) + bc_ref[...]       # (N,F)

    # -------- message passing as one weighted-adjacency matmul --------
    E = src_ref.shape[0]
    N = x_ref.shape[0]

    # weighted source one-hot: w_src_oh[e, n] = ew[e] if src[e] == n else 0
    w_src_oh = jnp.where(
        src_ref[...] == jax.lax.broadcasted_iota(jnp.int32, (E, N), 1),
        ew_ref[...], jnp.float32(0.0))                                  # (E,N)

    # destination one-hot: dst_oh[n, e] = (dst[e] == n)
    dst_oh = (jax.lax.broadcasted_iota(jnp.int32, (N, E), 0)
              == dst_ref[...]).astype(jnp.float32)                      # (N,E)

    # A[i, j] = sum_e ew[e] * [dst[e]==i] * [src[e]==j]   (MXU, exact f32)
    adj = jnp.dot(dst_oh, w_src_oh, preferred_element_type=jnp.float32)  # (N,N)
    o_ref[...] = jnp.dot(adj, z, preferred_element_type=jnp.float32)     # (N,F)


def prepare_qvalue_params(params, use_bf16=True):
    """Hoisted, one-time parameter prep (transpose / reshape / optional bf16 cast).

    params = (a0_w (1,1), W1 (F,F), b1 (F,), Wc (F,F), bc (F,)) in torch layout.
    Call once at init; pass the result to qvalue_net_block on every forward.
    """
    a0_w, W1, b1, Wc, bc = params
    wdt = jnp.bfloat16 if use_bf16 else jnp.float32
    a0 = jnp.asarray(a0_w, jnp.float32).reshape(1, 1)
    w1t = jnp.asarray(W1, jnp.float32).T.astype(wdt)      # pre-transposed (in, out)
    b1r = jnp.asarray(b1, jnp.float32).reshape(1, -1)
    wct = jnp.asarray(Wc, jnp.float32).T.astype(wdt)
    bcr = jnp.asarray(bc, jnp.float32).reshape(1, -1)
    return (a0, w1t, b1r, wct, bcr)


@jax.jit
def qvalue_net_block(x, edge_index, edge_weights, states, prepared_params,
                     self_weights=None):
    """Fused QValueNetBlock forward. `prepared_params` from prepare_qvalue_params."""
    a0, w1t, b1r, wct, bcr = prepared_params
    N, F = x.shape

    # add_self_loops(edge_index, edge_weight, fill_value=self_weights)
    # (edge-list concat is inherent per-call data prep, kept in the wrapper)
    if self_weights is not None:
        loop = jnp.arange(N, dtype=edge_index.dtype)
        edge_index = jnp.concatenate([edge_index, jnp.stack([loop, loop])], axis=1)
        sw = jnp.broadcast_to(jnp.asarray(self_weights, edge_weights.dtype), (N,))
        edge_weights = jnp.concatenate([edge_weights, sw])

    E = edge_index.shape[1]
    xf = x.astype(jnp.float32)
    st = states.astype(jnp.float32).reshape(N, 1)
    src = edge_index[0].astype(jnp.int32).reshape(E, 1)
    dst = edge_index[1].astype(jnp.int32).reshape(1, E)
    ew = edge_weights.astype(jnp.float32).reshape(E, 1)

    def full_block(shape):
        return pl.BlockSpec(shape, lambda i: (0, 0))

    return pl.pallas_call(
        _qvalue_kernel,
        out_shape=jax.ShapeDtypeStruct((N, F), jnp.float32),
        grid_spec=pltpu.PrefetchScalarGridSpec(
            num_scalar_prefetch=0,
            grid=(1,),
            in_specs=[
                pl.BlockSpec(memory_space=pltpu.MemorySpace.SMEM),  # alpha0 (1,1)
                full_block((N, F)),          # x
                full_block((N, 1)),          # states column
                full_block(w1t.shape),       # alpha1 weight^T
                full_block((1, F)),          # alpha1 bias
                full_block(wct.shape),       # conv.lin weight^T
                full_block((1, F)),          # conv.lin bias
                full_block((E, 1)),          # edge src indices
                full_block((1, E)),          # edge dst indices
                full_block((E, 1)),          # edge weights
            ],
            out_specs=full_block((N, F)),
        ),
        compiler_params=pltpu.CompilerParams(
            dimension_semantics=("arbitrary",),
        ),
    )(a0, xf, st, w1t, b1r, wct, bcr, src, dst, ew)


def qvalue_net_block_ref(x, edge_index, edge_weights, states, params,
                         self_weights=None):
    # Pure-JAX reference written 1:1 against the torch forward.
    a0_w, W1, b1, Wc, bc = params
    N = x.shape[0]
    if self_weights is not None:
        loop = jnp.arange(N, dtype=edge_index.dtype)
        edge_index = jnp.concatenate([edge_index, jnp.stack([loop, loop])], axis=1)
        sw = jnp.broadcast_to(jnp.asarray(self_weights, edge_weights.dtype), (N,))
        edge_weights = jnp.concatenate([edge_weights, sw])
    h = x + states.reshape(-1, 1) * jnp.asarray(a0_w).reshape(())
    y = jax.nn.leaky_relu(h @ W1.T + b1, negative_slope=0.2)
    z = y @ Wc.T + bc
    src, dst = edge_index[0], edge_index[1]
    msg = edge_weights[:, None] * z[src]
    return jnp.zeros_like(z).at[dst].add(msg)


if __name__ == "__main__":
    N, F, E = 16, 32, 40

    key = jax.random.PRNGKey(0)
    ks = jax.random.split(key, 11)
    x = jax.random.normal(ks[0], (N, F), dtype=jnp.float32)
    states = jax.random.normal(ks[1], (N,), dtype=jnp.float32)
    src = jax.random.randint(ks[2], (E,), 0, N, dtype=jnp.int32)
    dst = jax.random.randint(ks[3], (E,), 0, N, dtype=jnp.int32)
    edge_index = jnp.stack([src, dst])
    edge_weights = jax.random.uniform(ks[4], (E,), dtype=jnp.float32,
                                      minval=0.1, maxval=1.0)

    bound = 1.0 / (F ** 0.5)
    a0_w = jax.random.uniform(ks[5], (1, 1), dtype=jnp.float32, minval=-1.0, maxval=1.0)
    W1 = jax.random.uniform(ks[6], (F, F), dtype=jnp.float32, minval=-bound, maxval=bound)
    b1 = jax.random.uniform(ks[7], (F,), dtype=jnp.float32, minval=-bound, maxval=bound)
    Wc = jax.random.uniform(ks[8], (F, F), dtype=jnp.float32, minval=-bound, maxval=bound)
    bc = jax.random.uniform(ks[9], (F,), dtype=jnp.float32, minval=-bound, maxval=bound)
    raw_params = (a0_w, W1, b1, Wc, bc)

    ref = qvalue_net_block_ref(x, edge_index, edge_weights, states, raw_params)

    # exact f32 path (dense weights kept f32)
    p_f32 = prepare_qvalue_params(raw_params, use_bf16=False)
    out = jax.block_until_ready(
        qvalue_net_block(x, edge_index, edge_weights, states, p_f32))
    assert out.shape == (N, F)
    assert jnp.allclose(out, ref, atol=5e-3, rtol=5e-3)

    # perf path: bf16 inputs to the two dense Linears, f32 accumulation
    p_bf16 = prepare_qvalue_params(raw_params, use_bf16=True)
    out_bf = jax.block_until_ready(
        qvalue_net_block(x, edge_index, edge_weights, states, p_bf16))
    assert jnp.allclose(out_bf, ref, atol=5e-2, rtol=5e-2)

    # self-loop path (add_self_loops with fill_value=self_weights)
    sw = jax.random.uniform(ks[10], (N,), dtype=jnp.float32, minval=0.5, maxval=1.5)
    out2 = jax.block_until_ready(
        qvalue_net_block(x, edge_index, edge_weights, states, p_f32,
                         self_weights=sw))
    ref2 = qvalue_net_block_ref(x, edge_index, edge_weights, states, raw_params,
                                self_weights=sw)
    assert jnp.allclose(out2, ref2, atol=5e-3, rtol=5e-3)

    print("KERNEL_OK")
</pallas_src>

<mosaic_0001>
module attributes {stable_mosaic.version = 11 : i64} {
  func.func @_qvalue_kernel(%arg0: i32, %arg1: memref<1x1xf32, #tpu.memory_space<smem>>, %arg2: memref<16x32xf32, #tpu.memory_space<vmem>>, %arg3: memref<16x1xf32, #tpu.memory_space<vmem>>, %arg4: memref<32x32xf32, #tpu.memory_space<vmem>>, %arg5: memref<1x32xf32, #tpu.memory_space<vmem>>, %arg6: memref<32x32xf32, #tpu.memory_space<vmem>>, %arg7: memref<1x32xf32, #tpu.memory_space<vmem>>, %arg8: memref<40x1xi32, #tpu.memory_space<vmem>>, %arg9: memref<1x40xi32, #tpu.memory_space<vmem>>, %arg10: memref<40x1xf32, #tpu.memory_space<vmem>>, %arg11: memref<16x32xf32, #tpu.memory_space<vmem>>) attributes {dimension_semantics = [#tpu.dimension_semantics<arbitrary>], iteration_bounds = array<i64: 1>, scalar_prefetch = 0 : i64, scratch_operands = 0 : i64, tpu.core_type = #tpu.core_type<tc>, window_params = [{transform_indices = @transform_0, window_bounds = array<i64: 1, 1>}, {pipeline_mode = #tpu.pipeline_mode<synchronous>, transform_indices = @transform_1, window_bounds = array<i64: 16, 32>}, {pipeline_mode = #tpu.pipeline_mode<synchronous>, transform_indices = @transform_2, window_bounds = array<i64: 16, 1>}, {pipeline_mode = #tpu.pipeline_mode<synchronous>, transform_indices = @transform_3, window_bounds = array<i64: 32, 32>}, {pipeline_mode = #tpu.pipeline_mode<synchronous>, transform_indices = @transform_4, window_bounds = array<i64: 1, 32>}, {pipeline_mode = #tpu.pipeline_mode<synchronous>, transform_indices = @transform_5, window_bounds = array<i64: 32, 32>}, {pipeline_mode = #tpu.pipeline_mode<synchronous>, transform_indices = @transform_6, window_bounds = array<i64: 1, 32>}, {pipeline_mode = #tpu.pipeline_mode<synchronous>, transform_indices = @transform_7, window_bounds = array<i64: 40, 1>}, {pipeline_mode = #tpu.pipeline_mode<synchronous>, transform_indices = @transform_8, window_bounds = array<i64: 1, 40>}, {pipeline_mode = #tpu.pipeline_mode<synchronous>, transform_indices = @transform_9, window_bounds = array<i64: 40, 1>}, {pipeline_mode = #tpu.pipeline_mode<synchronous>, transform_indices = @transform_10, window_bounds = array<i64: 16, 32>}]} {
    %c0 = arith.constant 0 : index
    %c0_0 = arith.constant 0 : index
    %0 = memref.load %arg1[%c0, %c0_0] : memref<1x1xf32, #tpu.memory_space<smem>>
    %c0_1 = arith.constant 0 : index
    %c0_2 = arith.constant 0 : index
    %1 = vector.load %arg2[%c0_1, %c0_2] : memref<16x32xf32, #tpu.memory_space<vmem>>, vector<16x32xf32>
    %c0_3 = arith.constant 0 : index
    %c0_4 = arith.constant 0 : index
    %2 = vector.load %arg3[%c0_3, %c0_4] : memref<16x1xf32, #tpu.memory_space<vmem>>, vector<16x1xf32>
    %3 = vector.broadcast %0 : f32 to vector<16x1xf32>
    %4 = arith.mulf %2, %3 : vector<16x1xf32>
    %5 = vector.broadcast %4 : vector<16x1xf32> to vector<16x32xf32>
    %6 = arith.addf %1, %5 : vector<16x32xf32>
    %c0_5 = arith.constant 0 : index
    %c0_6 = arith.constant 0 : index
    %7 = vector.load %arg4[%c0_5, %c0_6] : memref<32x32xf32, #tpu.memory_space<vmem>>, vector<32x32xf32>
    %cst = arith.constant dense<0.000000e+00> : vector<16x32xf32>
    %8 = tpu.matmul %6, %7, %cst {dimension_numbers = #tpu.dot_dimension_numbers<[1], [0], [0], [1], [0, 0, 1, 1], [], []>} : vector<16x32xf32>, vector<32x32xf32>, vector<16x32xf32> -> vector<16x32xf32>
    %c0_7 = arith.constant 0 : index
    %c0_8 = arith.constant 0 : index
    %9 = vector.load %arg5[%c0_7, %c0_8] : memref<1x32xf32, #tpu.memory_space<vmem>>, vector<1x32xf32>
    %10 = vector.broadcast %9 : vector<1x32xf32> to vector<16x32xf32>
    %11 = arith.addf %8, %10 : vector<16x32xf32>
    %cst_9 = arith.constant 0.000000e+00 : f32
    %12 = vector.broadcast %cst_9 : f32 to vector<16x32xf32>
    %13 = arith.cmpf ogt, %11, %12 : vector<16x32xf32>
    %cst_10 = arith.constant 2.000000e-01 : f32
    %14 = vector.broadcast %cst_10 : f32 to vector<16x32xf32>
    %15 = arith.mulf %14, %11 : vector<16x32xf32>
    %16 = arith.select %13, %11, %15 : vector<16x32xi1>, vector<16x32xf32>
    %c0_11 = arith.constant 0 : index
    %c0_12 = arith.constant 0 : index
    %17 = vector.load %arg6[%c0_11, %c0_12] : memref<32x32xf32, #tpu.memory_space<vmem>>, vector<32x32xf32>
    %cst_13 = arith.constant dense<0.000000e+00> : vector<16x32xf32>
    %18 = tpu.matmul %16, %17, %cst_13 {dimension_numbers = #tpu.dot_dimension_numbers<[1], [0], [0], [1], [0, 0, 1, 1], [], []>} : vector<16x32xf32>, vector<32x32xf32>, vector<16x32xf32> -> vector<16x32xf32>
    %c0_14 = arith.constant 0 : index
    %c0_15 = arith.constant 0 : index
    %19 = vector.load %arg7[%c0_14, %c0_15] : memref<1x32xf32, #tpu.memory_space<vmem>>, vector<1x32xf32>
    %20 = vector.broadcast %19 : vector<1x32xf32> to vector<16x32xf32>
    %21 = arith.addf %18, %20 : vector<16x32xf32>
    %c0_16 = arith.constant 0 : index
    %c0_17 = arith.constant 0 : index
    %22 = vector.load %arg8[%c0_16, %c0_17] : memref<40x1xi32, #tpu.memory_space<vmem>>, vector<40x1xi32>
    %23 = tpu.iota {dimensions = array<i32: 1>} : vector<40x16xi32>
    %24 = vector.broadcast %22 : vector<40x1xi32> to vector<40x16xi32>
    %25 = arith.cmpi eq, %24, %23 : vector<40x16xi32>
    %c0_18 = arith.constant 0 : index
    %c0_19 = arith.constant 0 : index
    %26 = vector.load %arg10[%c0_18, %c0_19] : memref<40x1xf32, #tpu.memory_space<vmem>>, vector<40x1xf32>
    %cst_20 = arith.constant 0.000000e+00 : f32
    %27 = vector.shape_cast %26 : vector<40x1xf32> to vector<40x1xf32>
    %28 = vector.broadcast %27 : vector<40x1xf32> to vector<40x16xf32>
    %29 = vector.broadcast %cst_20 : f32 to vector<40x16xf32>
    %30 = arith.select %25, %28, %29 : vector<40x16xi1>, vector<40x16xf32>
    %31 = tpu.iota {dimensions = array<i32: 0>} : vector<16x40xi32>
    %c0_21 = arith.constant 0 : index
    %c0_22 = arith.constant 0 : index
    %32 = vector.load %arg9[%c0_21, %c0_22] : memref<1x40xi32, #tpu.memory_space<vmem>>, vector<1x40xi32>
    %33 = vector.broadcast %32 : vector<1x40xi32> to vector<16x40xi32>
    %34 = arith.cmpi eq, %31, %33 : vector<16x40xi32>
    %35 = arith.extui %34 : vector<16x40xi1> to vector<16x40xi32>
    %36 = arith.sitofp %35 : vector<16x40xi32> to vector<16x40xf32>
    %cst_23 = arith.constant dense<0.000000e+00> : vector<16x16xf32>
    %37 = tpu.matmul %36, %30, %cst_23 {dimension_numbers = #tpu.dot_dimension_numbers<[1], [0], [0], [1], [0, 0, 1, 1], [], []>} : vector<16x40xf32>, vector<40x16xf32>, vector<16x16xf32> -> vector<16x16xf32>
    %cst_24 = arith.constant dense<0.000000e+00> : vector<16x32xf32>
    %38 = tpu.matmul %37, %21, %cst_24 {dimension_numbers = #tpu.dot_dimension_numbers<[1], [0], [0], [1], [0, 0, 1, 1], [], []>} : vector<16x16xf32>, vector<16x32xf32>, vector<16x32xf32> -> vector<16x32xf32>
    %c0_25 = arith.constant 0 : index
    %c0_26 = arith.constant 0 : index
    %39 = vector.load %arg11[%c0_25, %c0_26] : memref<16x32xf32, #tpu.memory_space<vmem>>, vector<16x32xf32>
    tpu.vector_store %arg11[%c0_25, %c0_26], %38 {strides = array<i32>} : memref<16x32xf32, #tpu.memory_space<vmem>>, vector<16x32xf32>,
    return
  }
  func.func @transform_0(%arg0: i32) -> (i32, i32) {
    %c0_i32 = arith.constant 0 : i32
    %c0_i32_0 = arith.constant 0 : i32
    %c0_i32_1 = arith.constant 0 : i32
    return %c0_i32, %c0_i32_0 : i32, i32
  }
  func.func @transform_1(%arg0: i32) -> (i32, i32) {
    %c0_i32 = arith.constant 0 : i32
    %c0_i32_0 = arith.constant 0 : i32
    %c0_i32_1 = arith.constant 0 : i32
    return %c0_i32, %c0_i32_0 : i32, i32
  }
  func.func @transform_2(%arg0: i32) -> (i32, i32) {
    %c0_i32 = arith.constant 0 : i32
    %c0_i32_0 = arith.constant 0 : i32
    %c0_i32_1 = arith.constant 0 : i32
    return %c0_i32, %c0_i32_0 : i32, i32
  }
  func.func @transform_3(%arg0: i32) -> (i32, i32) {
    %c0_i32 = arith.constant 0 : i32
    %c0_i32_0 = arith.constant 0 : i32
    %c0_i32_1 = arith.constant 0 : i32
    return %c0_i32, %c0_i32_0 : i32, i32
  }
  func.func @transform_4(%arg0: i32) -> (i32, i32) {
    %c0_i32 = arith.constant 0 : i32
    %c0_i32_0 = arith.constant 0 : i32
    %c0_i32_1 = arith.constant 0 : i32
    return %c0_i32, %c0_i32_0 : i32, i32
  }
  func.func @transform_5(%arg0: i32) -> (i32, i32) {
    %c0_i32 = arith.constant 0 : i32
    %c0_i32_0 = arith.constant 0 : i32
    %c0_i32_1 = arith.constant 0 : i32
    return %c0_i32, %c0_i32_0 : i32, i32
  }
  func.func @transform_6(%arg0: i32) -> (i32, i32) {
    %c0_i32 = arith.constant 0 : i32
    %c0_i32_0 = arith.constant 0 : i32
    %c0_i32_1 = arith.constant 0 : i32
    return %c0_i32, %c0_i32_0 : i32, i32
  }
  func.func @transform_7(%arg0: i32) -> (i32, i32) {
    %c0_i32 = arith.constant 0 : i32
    %c0_i32_0 = arith.constant 0 : i32
    %c0_i32_1 = arith.constant 0 : i32
    return %c0_i32, %c0_i32_0 : i32, i32
  }
  func.func @transform_8(%arg0: i32) -> (i32, i32) {
    %c0_i32 = arith.constant 0 : i32
    %c0_i32_0 = arith.constant 0 : i32
    %c0_i32_1 = arith.constant 0 : i32
    return %c0_i32, %c0_i32_0 : i32, i32
  }
  func.func @transform_9(%arg0: i32) -> (i32, i32) {
    %c0_i32 = arith.constant 0 : i32
    %c0_i32_0 = arith.constant 0 : i32
    %c0_i32_1 = arith.constant 0 : i32
    return %c0_i32, %c0_i32_0 : i32, i32
  }
  func.func @transform_10(%arg0: i32) -> (i32, i32) {
    %c0_i32 = arith.constant 0 : i32
    %c0_i32_0 = arith.constant 0 : i32
    %c0_i32_1 = arith.constant 0 : i32
    return %c0_i32, %c0_i32_0 : i32, i32
  }
}

</mosaic_0001>

<bundles_post_ra>
// kernel: qvalue_net_block.1
= control target key start
LH: loop header
LB: loop body
LE: loop exit
PB: predicated region body
PF: predicated region fallthrough
CT: control target
= control target key end

     0   :  { %v618_v4 = vmov 0   ;;  %s765_s0 = inlined_call_operand.<no memory space> [shape: f32[1,1], index: 0, kind: input, shape index: {}]   ;;  %s766_s1 = inlined_call_operand.vmem [shape: f32[16,32], index: 1, kind: input, shape index: {}]   ;;  %s767_s2 = inlined_call_operand.vmem [shape: f32[16,1], index: 2, kind: input, shape index: {}]   ;;  %s768_s3 = inlined_call_operand.vmem [shape: f32[32,32], index: 3, kind: input, shape index: {}]   ;;  %s769_s4 = inlined_call_operand.vmem [shape: f32[1,32], index: 4, kind: input, shape index: {}]   ;;  %s770_s5 = inlined_call_operand.vmem [shape: f32[32,32], index: 5, kind: input, shape index: {}]   ;;  %s771_s6 = inlined_call_operand.vmem [shape: f32[1,32], index: 6, kind: input, shape index: {}]   ;;  %s772_s7 = inlined_call_operand.vmem [shape: s32[40,1], index: 7, kind: input, shape index: {}]   ;;  %s773_s8 = inlined_call_operand.vmem [shape: s32[1,40], index: 8, kind: input, shape index: {}]   ;;  %s774_s9 = inlined_call_operand.vmem [shape: f32[40,1], index: 9, kind: input, shape index: {}]   ;;  %s775_s10 = inlined_call_operand.hbm [shape: f32[16,32], index: 10, kind: output, shape index: {}]  }
   0x1   :  { %v40_v0 = vld [vmem:[%s767_s2] sm:$0xff]  ;;  %v41_v1 = vld [vmem:[%s767_s2 + $0x8] sm:$0xff]  ;;  %v42_v2 = vstv %s765_s0  ;;  %594 = vset.pattern.permute.xlu0 %v618_v4  ;;  %595 = vset.pattern.permute.xlu1 %v618_v4  ;;  %v60_v8 = vld [vmem:[%s768_s3 + $0x18] sm:$0xff] }
   0x2   :  { %v252_v3 = vld [vmem:[%s772_s7 + $0x20] sm:$0xff]  ;;  %v43_v5 = vmul.f32 %v42_v2, %v40_v0  ;;  %v44_v6 = vmul.f32 %v42_v2, %v41_v1  ;;  %v59_v9 = vld [vmem:[%s768_s3 + $0x10] sm:$0xff]  ;;  %547 = vmatprep.subr.mxu0 %v60_v8  ;;  %v58_v10 = vld [vmem:[%s768_s3 + $0x8] sm:$0xff] }
   0x3   :  { %268 = vperm.xlu1 %595, %v252_v3   ;;  %v279_v7 = vld [vmem:[%s774_s9 + $0x20] sm:$0xff]  ;;  %548 = vmatpush3.msra.mxu0 %v60_v8 }
   0x4   :  { %47 = vperm.xlu0 %594, %v43_v5  }
   0x7   :  { %302 = vperm.xlu1 %595, %v279_v7  }
   0x8   :  { %16 = vsyncpa [#allocation4], 0  ;;  %52 = vperm.xlu0 %594, %v44_v6   ;;  %v278_v11 = vld [vmem:[%s774_s9 + $0x18] sm:$0xff]  ;;  %549 = vmatprep.subr.mxu0 %v59_v9  ;;  %v57_v13 = vld [vmem:[%s768_s3] sm:$0xff]  ;;  %v253_v20 = vlaneseq  ;;  %vm68_vm0 = vcmask 261120   ;;  %v619_v45 = vmov 0.0  }
   0x9   :  { %v251_v12 = vld [vmem:[%s772_s7 + $0x18] sm:$0xff]  ;;  %550 = vmatpush3.msra.mxu0 %v59_v9  ;;  %v277_v14 = vld [vmem:[%s774_s9 + $0x10] sm:$0xff]  ;;  %v276_v16 = vld [vmem:[%s774_s9 + $0x8] sm:$0xff]  ;;  %vm324_vm8 = vcmask 326656   ;;  %vm406_vm11 = vcmask 130048   ;;  %s620_s14 = smov [#allocation3]  }
   0xa   :  { %551 = vmatprep.subr.mxu0 %v58_v10  ;;  %v250_v15 = vld [vmem:[%s772_s7 + $0x10] sm:$0xff]  ;;  %v249_v17 = vld [vmem:[%s772_s7 + $0x8] sm:$0xff]  ;;  %v275_v18 = vld [vmem:[%s774_s9] sm:$0xff]  ;;  %v254_v21 = vand.u32 127, %v253_v20  ;;  %v311_v42 = vshrl.u32 %v253_v20, 7  ;;  %s495_s15 = sshll.u32 %s620_s14, 4  ;;  %s496_s15 = int_to_ptr.vmem [resolvable:$true] %s495_s15 }
   0xb   :  { %297 = vperm.xlu1 %595, %v278_v11   ;;  %552 = vmatpush3.msra.mxu0 %v58_v10  ;;  %v248_v19 = vld [vmem:[%s772_s7] sm:$0xff]  ;;  %v39_v26 = vld [vmem:[%s766_s1 + $0x8] sm:$0xff]  ;;  %v159_v38 = vld [vmem:[%s770_s5 + $0x18] sm:$0xff]  ;;  %s596_s16 = scalar_lea.vmem %s496_s15, 256  ;;  %p601_p1 = scmp.lt.s32.totalorder %s496_s15, %s496_s15 }
   0xc   :  { %265 = vperm.xlu0 %594, %v251_v12   ;;  %553 = vmatprep.subr.mxu0 %v57_v13  ;;  %v38_v22 = vld [vmem:[%s766_s1] sm:$0xff]  ;;  %v158_v39 = vld [vmem:[%s770_s5 + $0x10] sm:$0xff]  ;;  %v157_v40 = vld [vmem:[%s770_s5 + $0x8] sm:$0xff]  ;;  %v312_v43 = vadd.s32 8, %v311_v42  ;;  %p597_p0 = scmp.ne.s32.totalorder %s496_s15, %s596_s16  ;;  %p602_p2 = scmp.lt.s32.totalorder %s596_s16, %s596_s16 }
   0xd   :  { %554 = vmatpush3.msra.mxu0 %v57_v13  ;;  %558 = vmatprep.subr.mxu1 %v159_v38  ;;  %v156_v41 = vld [vmem:[%s770_s5] sm:$0xff] }
   0xe   :  { %559 = vmatpush3.msra.mxu1 %v159_v38  ;;  %v512_v44 = vld [vmem:[%s773_s8] ss:$0 sm:$0xff]  ;;  %p603_p3 = por %p602_p2, %p601_p1 }
   0xf   :  { %292 = vperm.xlu1 %595, %v277_v14   ;;  %560 = vmatprep.subr.mxu1 %v158_v39  ;;  %vm318_vm6 = vcmp.eq.s32.totalorder %v311_v42, %v512_v44  ;;  %vm319_vm7 = vcmp.eq.s32.totalorder %v312_v43, %v512_v44  ;;  %v506_v48 = vld [vmem:[%s769_s4] ss:$0 sm:$0xff] }
  0x10   :  { %262 = vperm.xlu0 %594, %v250_v15   ;;  %561 = vmatpush3.msra.mxu1 %v158_v39  ;;  %v513_v46 = vsel %vm318_vm6, 1.0, %v619_v45  ;;  %v514_v47 = vsel %vm319_vm7, 1.0, %v619_v45  ;;  %v509_v59 = vld [vmem:[%s771_s6] ss:$0 sm:$0xff]  ;;  %p604_p4 = pnand %p603_p3, %p597_p0 }
  0x11   :  { %562 = vmatprep.subr.mxu1 %v157_v40 }
  0x12   :  { %563 = vmatpush3.msra.mxu1 %v157_v40 }
  0x13   :  { %287 = vperm.xlu1 %595, %v276_v16   ;;  %564 = vmatprep.subr.mxu1 %v156_v41 }
  0x14   :  { %259 = vperm.xlu0 %594, %v249_v17   ;;  %565 = vmatpush3.msra.mxu1 %v156_v41 }
  0x17   :  { %282 = vperm.xlu1 %595, %v275_v18  }
  0x18   :  { %256 = vperm.xlu0 %594, %v248_v19  }
  0x7e   :  { %v269_v23 = vpop.permute.xlu1 %268 }
  0x7f   :  { %v48_v24 = vpop.permute.xlu0 %47  ;;  %vm274_vm1 = vcmp.eq.s32.totalorder %v269_v23, %v254_v21 }
  0x80   :  { %v55_v25 = vadd.f32 %v48_v24, %v38_v22 }
  0x82   :  { %555 = vmatprep.mubr.msk.f32.mxu0 %vm68_vm0, %v55_v25  ;;  %v303_v27 = vpop.permute.xlu1 %302 }
  0x83   :  { %v53_v28 = vpop.permute.xlu0 %52  ;;  %569 = vmatprep.subr.msk.mxu0 %vm274_vm1, %v303_v27 }
  0x84   :  { %v56_v29 = vadd.f32 %v53_v28, %v39_v26 }
  0x86   :  { %556 = vmatmul.mubr.msk.f32.vlgmr.msra.gmra.mxu0 %vm68_vm0, %v56_v29  ;;  %v298_v30 = vpop.permute.xlu1 %297 }
  0x87   :  { %v266_v31 = vpop.permute.xlu0 %265  ;;  %570 = vmatpush3.msk.msra.mxu0 %vm274_vm1, %v303_v27  ;;  %579 = vmatprep.mubr.msk.f32.mxu0 %vm324_vm8, %v513_v46 }
  0x88   :  { %vm273_vm2 = vcmp.eq.s32.totalorder %v266_v31, %v254_v21 }
  0x89   :  { %571 = vmatprep.subr.msk.mxu0 %vm273_vm2, %v298_v30 }
  0x8a   :  { %572 = vmatpush3.msk.msra.mxu0 %vm273_vm2, %v298_v30  ;;  %v293_v32 = vpop.permute.xlu1 %292 }
  0x8b   :  { %v263_v33 = vpop.permute.xlu0 %262 }
  0x8c   :  { %vm272_vm3 = vcmp.eq.s32.totalorder %v263_v33, %v254_v21 }
  0x8d   :  { %573 = vmatprep.subr.msk.mxu0 %vm272_vm3, %v293_v32 }
  0x8e   :  { %574 = vmatpush3.msk.msra.mxu0 %vm272_vm3, %v293_v32  ;;  %v288_v34 = vpop.permute.xlu1 %287 }
  0x8f   :  { %v260_v35 = vpop.permute.xlu0 %259 }
  0x90   :  { %vm271_vm4 = vcmp.eq.s32.totalorder %v260_v35, %v254_v21 }
  0x91   :  { %575 = vmatprep.subr.msk.mxu0 %vm271_vm4, %v288_v34 }
  0x92   :  { %576 = vmatpush3.msk.msra.mxu0 %vm271_vm4, %v288_v34  ;;  %v283_v36 = vpop.permute.xlu1 %282 }
  0x93   :  { %v257_v37 = vpop.permute.xlu0 %256 }
  0x94   :  { %vm270_vm5 = vcmp.eq.s32.totalorder %v257_v37, %v254_v21 }
  0x95   :  { %577 = vmatprep.subr.msk.mxu0 %vm270_vm5, %v283_v36 }
  0x96   :  { %578 = vmatpush3.msk.msra.mxu0 %vm270_vm5, %v283_v36 }
  0x97   :  { %580 = vmatmul.mubr.msk.f32.vlgmr.msra.gmra.mxu0 %vm324_vm8, %v514_v47 }
 0x146   :  { %v557_v49 = vpop.f32.mrf.mxu0 }
 0x147   :  { %v147_v50 = vadd.f32 %v557_v49, %v506_v48 }
 0x148   :  { %v141_v51 = vpop.f32.mrf.mxu0 }
 0x149   :  { %v142_v52 = vadd.f32 %v506_v48, %v141_v51  ;;  %v153_v53 = vmul.f32 0.2, %v147_v50  ;;  %vm151_vm9 = vcmp.gt.f32.partialorder %v147_v50, 0.0 }
 0x14b   :  { %vm150_vm10 = vcmp.gt.f32.partialorder %v142_v52, 0.0  ;;  %v152_v54 = vmul.f32 0.2, %v142_v52  ;;  %v155_v56 = vsel %vm151_vm9, %v147_v50, %v153_v53 }
 0x14d   :  { %v154_v55 = vsel %vm150_vm10, %v142_v52, %v152_v54 }
 0x14e   :  { %566 = vmatprep.mubr.msk.f32.mxu1 %vm68_vm0, %v154_v55 }
 0x14f   :  { %567 = vmatmul.mubr.msk.f32.vlgmr.msra.gmra.mxu1 %vm68_vm0, %v155_v56 }
 0x157   :  { %v581_v57 = vpop.f32.mrf.mxu0 }
 0x159   :  { %v397_v58 = vpop.f32.mrf.mxu0 }
 0x15a   :  { %586 = vmatprep.mubr.msk.f32.mxu1 %vm406_vm11, %v397_v58 }
 0x20f   :  { %v568_v60 = vpop.f32.mrf.mxu1 }
 0x210   :  { %v245_v61 = vadd.f32 %v568_v60, %v509_v59 }
 0x211   :  { %v239_v62 = vpop.f32.mrf.mxu1 }
 0x212   :  { %v240_v63 = vadd.f32 %v509_v59, %v239_v62  ;;  %582 = vmatprep.subr.mxu1 %v245_v61 }
 0x213   :  { %583 = vmatpush3.msra.mxu1 %v245_v61 }
 0x214   :  { %584 = vmatprep.subr.mxu1 %v240_v63 }
 0x215   :  { %585 = vmatpush3.msra.mxu1 %v240_v63 }
 0x216   :  { %587 = vmatmul.mubr.msk.f32.vlgmr.msra.gmra.mxu1 %vm406_vm11, %v581_v57 }
 0x2d6   :  { %v588_v0 = vpop.f32.mrf.mxu1 }
 0x2d7   :  { %489 = vst.msk [vmem:[#allocation3 + $0x8] sm:$0xff] %vm68_vm0, %v588_v0 }
 0x2d8   :  { %v479_v1 = vpop.f32.mrf.mxu1 }
 0x2d9   :  { %488 = vst.msk [vmem:[#allocation3] sm:$0xff] %vm68_vm0, %v479_v1 }
 0x2da   :  { %607 = shalt.err (!%p604_p4)
}
 0x2db   :  { %s621_s6 = smov 128   ;;  %s622_s17 = smov 8  }
 0x2dc   :  { %501 = dma.vmem_to_hbm [thread:$0]  %s496_s15, 256, %s775_s10, [#allocation4], %s621_s6, %s621_s6, %s622_s17  }
 0x2dd   :  { %616 = dma.done.wait [#allocation4], 256  }
 0x2de   :  { %617 = vsyncadd [#allocation4], 4294967040 }
 0x2df   :  { %505 = vsyncpa [#allocation4], 1 }

</bundles_post_ra>
